<compile_context>
chip_gen: v6e
topology: v6e:2x2x1
jax: 0.10.0
libtpu: 0.0.40
codegen_flags: <defaults>
</compile_context>

<pallas_src>
import numpy as np

import jax
import jax.numpy as jnp
from jax.experimental import pallas as pl
from jax.experimental.pallas import tpu as pltpu


def _round_up(x, m):
    return ((x + m - 1) // m) * m


def _largest_tile(total, base, cap):
    """Largest multiple of `base` that divides `total` and is <= cap (>= base)."""
    cap = max(base, min(cap, total))
    best = base
    d = base
    while d <= cap:
        if total % d == 0:
            best = d
        d += base
    return best


def _vmem_params():
    """(vmem_limit_bytes, block_budget_bytes) sized for the local chip.

    v5e/v6e have 128 MiB physical VMEM -> large tiles; v7x has 64 MiB -> tighter.
    Falls back to the most conservative (v7x-sized) numbers if the query fails.
    """
    phys = 64 * 1024 * 1024
    try:
        phys = int(pltpu.get_tpu_info().vmem_capacity_bytes)
    except Exception:
        pass
    limit = min(phys // 2, 96 * 1024 * 1024)
    return limit, (limit * 3) // 4


def _pick_tiles(R, N, F, out_itemsize, block_budget):
    """Choose (tile_r, tile_n) under a double-buffered VMEM budget."""
    # Column tile: multiple of 128 dividing N (N is 128-padded by construction).
    tile_n = _largest_tile(N, 128, 4096)

    def _row_cap(tn):
        w_bytes = 2 * F * tn * 2                       # bf16 weight, double-buffered
        per_row = 2 * tn * out_itemsize + 2 * F * 2    # out + bf16 feats, dbl-buffered
        return max(8, min((block_budget - w_bytes) // per_row, 2048))

    tile_r = _largest_tile(R, 8, _row_cap(tile_n))
    # If even 8 rows of output don't fit, shrink the column tile.
    while (2 * 8 * tile_n * out_itemsize + 2 * F * tile_n * 2 > block_budget
           and tile_n > 128):
        tile_n = _largest_tile(N, 128, tile_n // 2)
        tile_r = _largest_tile(R, 8, _row_cap(tile_n))

    # Keep >= 2 grid tiles when possible so both v7x TensorCores get work.
    if (R // tile_r) * (N // tile_n) < 2:
        if R >= 16:
            tile_r = _largest_tile(R, 8, max(8, tile_r // 2))
        elif N >= 256:
            tile_n = _largest_tile(N, 128, max(128, tile_n // 2))
    return tile_r, tile_n


def _render_kernel(feat_ref, w_ref, out_ref):
    # feat_ref: (tile_r, F)      bf16  rows = [params | pos | cos(theta_v) | sin(theta_v)]
    # w_ref   : (F, tile_n)      bf16  synthetic light-basis projection
    # out_ref : (tile_r, tile_n) f32   lumitexel block (lane-dense, unmasked stores)
    acc = jnp.dot(feat_ref[...], w_ref[...], preferred_element_type=jnp.float32)
    out_ref[...] = jnp.maximum(acc, 0.0).astype(out_ref.dtype)


def _render(feat, w, *, tile_r, tile_n, out_dtype, vmem_limit_bytes):
    R, F = feat.shape
    F2, N = w.shape
    assert F2 == F and R % tile_r == 0 and N % tile_n == 0
    out_itemsize = np.dtype(out_dtype).itemsize
    cost = pl.CostEstimate(
        flops=2 * R * F * N,
        transcendentals=0,
        bytes_accessed=(R * F * feat.dtype.itemsize
                        + F * N * w.dtype.itemsize
                        + R * N * out_itemsize),
    )
    return pl.pallas_call(
        _render_kernel,
        out_shape=jax.ShapeDtypeStruct((R, N), out_dtype),
        grid_spec=pltpu.PrefetchScalarGridSpec(
            num_scalar_prefetch=0,
            grid=(R // tile_r, N // tile_n),
            in_specs=[
                pl.BlockSpec((tile_r, F), lambda i, j: (i, 0)),
                pl.BlockSpec((F, tile_n), lambda i, j: (0, j)),
            ],
            out_specs=pl.BlockSpec((tile_r, tile_n), lambda i, j: (i, j)),
        ),
        compiler_params=pltpu.CompilerParams(
            dimension_semantics=("parallel", "parallel"),
            vmem_limit_bytes=vmem_limit_bytes,
        ),
        cost_estimate=cost,
    )(feat, w)


class MultiviewRendererPallas:
    """JAX/Pallas re-implementation of Multiview_Renderer.forward."""

    def __init__(self, rendering_view_num, lightnum, param_dim=11, seed=42,
                 out_dtype=jnp.float32):
        assert param_dim in (7, 11)
        self.rendering_view_num = rendering_view_num
        self.lightnum = lightnum
        self.param_dim = param_dim
        self.channel_num = 3 if param_dim == 11 else 1
        self.feat_dim = param_dim + 3 + 2            # [params | pos | cos | sin]
        self.lc = lightnum * self.channel_num
        self.lc_pad = _round_up(self.lc, 128)        # lane-dense output columns
        # Keep f32 output by default (matches the torch module); pass
        # out_dtype=jnp.bfloat16 to halve HBM writeback if the consumer tolerates it.
        self.out_dtype = out_dtype

        # TODO(synk): real torch_render.draw_rendering_net physics is external;
        # replaced with a deterministic synthetic light-basis projection.
        key = jax.random.PRNGKey(seed)
        w = jax.random.normal(key, (self.feat_dim, self.lc), jnp.float32) * 0.1
        w = jnp.pad(w, ((0, 0), (0, self.lc_pad - self.lc)))
        self.w = w.astype(jnp.bfloat16)              # (F, LCp), resident per column tile

    def __call__(self, input_params, input_positions, rotate_theta,
                 global_frame=None, return_tensor=False,
                 end_points_wanted_list=()):
        B, all_param_dim = input_params.shape
        assert all_param_dim == self.param_dim
        assert input_positions.shape == (B, 3)
        assert rotate_theta.shape == (B, self.rendering_view_num)
        V = self.rendering_view_num
        F = self.feat_dim

        # Per-(sample, view) feature rows in bf16.  Replicating the tiny base
        # features per view lets the whole multi-view render be ONE MXU matmul.
        base = jnp.concatenate(
            [input_params.astype(jnp.float32),
             input_positions.astype(jnp.float32)], axis=1)          # (B, F-2)
        theta = rotate_theta.astype(jnp.float32)
        feat = jnp.concatenate(
            [jnp.broadcast_to(base[:, None, :], (B, V, F - 2)),
             jnp.cos(theta)[..., None],
             jnp.sin(theta)[..., None]], axis=-1)                   # (B, V, F)
        feat = feat.reshape(B * V, F).astype(jnp.bfloat16)

        R = B * V
        R_pad = _round_up(R, 8)
        if R_pad != R:   # only ragged B*V pays a (<=7 row) pad + slice
            feat = jnp.pad(feat, ((0, R_pad - R), (0, 0)))

        vmem_limit, block_budget = _vmem_params()
        out_itemsize = np.dtype(self.out_dtype).itemsize
        tile_r, tile_n = _pick_tiles(R_pad, self.lc_pad, F, out_itemsize,
                                     block_budget)

        lumi = _render(feat, self.w, tile_r=tile_r, tile_n=tile_n,
                       out_dtype=self.out_dtype,
                       vmem_limit_bytes=vmem_limit)                 # (R_pad, LCp)

        if R_pad != R:
            lumi = lumi[:R]
        lumi = lumi.reshape(B, V, self.lc_pad)
        if self.lc_pad != self.lc:
            lumi = lumi[:, :, : self.lc]
        result = lumi.reshape(B, V, self.lightnum, self.channel_num)

        # TODO(synk): end_points come from the external renderer; only the
        # requested keys are returned as placeholders.
        result_end_points_list = [
            {k: None for k in end_points_wanted_list} for _ in range(V)
        ]
        if return_tensor:
            # Already batch-major: equals result_tensor.permute(1, 0, 2, 3).
            return result, result_end_points_list
        # return_tensor=False path: list of per-view (B, lightnum, channel_num).
        return [result[:, v] for v in range(V)], result_end_points_list


if __name__ == "__main__":
    batch_size = 8
    rendering_view_num = 4
    lightnum = 128
    param_dim = 11            # -> channel_num = 3, lc = 384 (multiple of 128)

    renderer = MultiviewRendererPallas(
        rendering_view_num=rendering_view_num,
        lightnum=lightnum,
        param_dim=param_dim,
    )

    key = jax.random.PRNGKey(0)
    k1, k2, k3 = jax.random.split(key, 3)
    input_params = jax.random.uniform(k1, (batch_size, param_dim), jnp.float32)
    input_positions = jax.random.normal(k2, (batch_size, 3), jnp.float32)
    rotate_theta = jax.random.uniform(
        k3, (batch_size, rendering_view_num), jnp.float32,
        minval=0.0, maxval=2.0 * jnp.pi,
    )

    result_tensor, end_points = renderer(
        input_params, input_positions, rotate_theta, return_tensor=True
    )
    result_tensor = jax.block_until_ready(result_tensor)

    expected_shape = (batch_size, rendering_view_num, lightnum, 3)
    assert result_tensor.shape == expected_shape, result_tensor.shape
    assert result_tensor.dtype == jnp.float32
    assert len(end_points) == rendering_view_num
    assert bool(jnp.all(jnp.isfinite(result_tensor)))
    assert bool(jnp.all(result_tensor >= 0.0))       # ReLU'd lumitexels

    # Cross-check against a plain-JAX reference of the same synthetic net.
    base = jnp.concatenate([input_params, input_positions], axis=1)
    feat_ref = jnp.concatenate(
        [jnp.broadcast_to(base[:, None, :],
                          (batch_size, rendering_view_num, param_dim + 3)),
         jnp.cos(rotate_theta)[..., None],
         jnp.sin(rotate_theta)[..., None]],
        axis=-1).astype(jnp.bfloat16).astype(jnp.float32)
    ref = jnp.maximum(
        feat_ref.reshape(-1, renderer.feat_dim) @ renderer.w.astype(jnp.float32),
        0.0,
    ).reshape(batch_size, rendering_view_num, lightnum, 3)
    assert bool(jnp.allclose(result_tensor, ref, atol=1e-2, rtol=1e-2))

    print("KERNEL_OK")
</pallas_src>

<mosaic_0001>
module attributes {stable_mosaic.version = 11 : i64} {
  func.func @_render_kernel(%arg0: i32, %arg1: i32, %arg2: memref<16x16xbf16, #tpu.memory_space<vmem>>, %arg3: memref<16x384xbf16, #tpu.memory_space<vmem>>, %arg4: memref<16x384xf32, #tpu.memory_space<vmem>>) attributes {dimension_semantics = [#tpu.dimension_semantics<parallel>, #tpu.dimension_semantics<parallel>], iteration_bounds = array<i64: 2, 1>, scalar_prefetch = 0 : i64, scratch_operands = 0 : i64, tpu.core_type = #tpu.core_type<tc>, window_params = [{transform_indices = @transform_0, window_bounds = array<i64: 16, 16>}, {transform_indices = @transform_1, window_bounds = array<i64: 16, 384>}, {transform_indices = @transform_2, window_bounds = array<i64: 16, 384>}]} {
    %c0 = arith.constant 0 : index
    %c0_0 = arith.constant 0 : index
    %0 = vector.load %arg2[%c0, %c0_0] : memref<16x16xbf16, #tpu.memory_space<vmem>>, vector<16x16xbf16>
    %c0_1 = arith.constant 0 : index
    %c0_2 = arith.constant 0 : index
    %1 = vector.load %arg3[%c0_1, %c0_2] : memref<16x384xbf16, #tpu.memory_space<vmem>>, vector<16x384xbf16>
    %cst = arith.constant dense<0.000000e+00> : vector<16x384xf32>
    %2 = tpu.matmul %0, %1, %cst {dimension_numbers = #tpu.dot_dimension_numbers<[1], [0], [0], [1], [0, 0, 1, 1], [], []>} : vector<16x16xbf16>, vector<16x384xbf16>, vector<16x384xf32> -> vector<16x384xf32>
    %cst_3 = arith.constant 0.000000e+00 : f32
    %3 = vector.broadcast %cst_3 : f32 to vector<16x384xf32>
    %4 = arith.maximumf %2, %3 : vector<16x384xf32>
    %c0_4 = arith.constant 0 : index
    %c0_5 = arith.constant 0 : index
    %5 = vector.load %arg4[%c0_4, %c0_5] : memref<16x384xf32, #tpu.memory_space<vmem>>, vector<16x384xf32>
    tpu.vector_store %arg4[%c0_4, %c0_5], %4 {strides = array<i32>} : memref<16x384xf32, #tpu.memory_space<vmem>>, vector<16x384xf32>,
    return
  }
  func.func @transform_0(%arg0: i32, %arg1: i32) -> (i32, i32) {
    %c0_i32 = arith.constant 0 : i32
    %c0_i32_0 = arith.constant 0 : i32
    return %arg0, %c0_i32 : i32, i32
  }
  func.func @transform_1(%arg0: i32, %arg1: i32) -> (i32, i32) {
    %c0_i32 = arith.constant 0 : i32
    %c0_i32_0 = arith.constant 0 : i32
    return %c0_i32, %arg1 : i32, i32
  }
  func.func @transform_2(%arg0: i32, %arg1: i32) -> (i32, i32) {
    %c0_i32 = arith.constant 0 : i32
    return %arg0, %arg1 : i32, i32
  }
}

</mosaic_0001>

<bundles_post_ra>
// kernel: tpu_custom_call.1
= control target key start
LH: loop header
LB: loop body
LE: loop exit
PB: predicated region body
PF: predicated region fallthrough
CT: control target
= control target key end

     0   :  { %7 = vsyncpa [#allocation3], 0  ;;  %s730_s0 = inlined_call_operand.vmem [shape: bf16[32,16], index: 0, kind: input, shape index: {}]   ;;  %s731_s1 = inlined_call_operand.vmem [shape: bf16[16,384], index: 1, kind: input, shape index: {}]   ;;  %s732_s2 = inlined_call_operand.hbm [shape: f32[32,384], index: 2, kind: output, shape index: {}]  }
   0x1   :  { %9 = vsyncpa [#allocation3 + $0x1], 0  ;;  %s608_s9 = smov 0   ;;  %s610_s10 = smov 0  }
   0x2   :  { %s612_s11 = smov 0   ;;  %s614_s12 = smov 0  }
   0x3   :  { %s616_s13 = smov 0   ;;  %s618_s14 = smov 0  }
   0x4 LB: > { %s415_s15 = sadd.s32 4294967295, %s585_s14   ;;  %s416_s16 = sadd.s32 4294967294, %s585_s14   ;;  %s585_s14 = sphi %s618_s14, %s15_s14   ;;  %s581_s13 = sphi %s616_s13, %s739_s13   ;;  %s577_s12 = sphi %s614_s12, %s738_s12   ;;  %s573_s11 = sphi %s612_s11, %s737_s11   ;;  %s569_s10 = sphi %s610_s10, %s736_s10   ;;  %s565_s9 = sphi %s608_s9, %s735_s9  }
   0x5   : > { %s27_s17 = sadd.s32 1, %s581_s13  ;;  %s88_s18 = sadd.s32 1, %s573_s11 }
   0x6   : > { %p29_p0 = scmp.ge.s32.totalorder %s27_s17, 2  ;;  %p98_p1 = scmp.ne.s32.totalorder %s573_s11, %s569_s10 }
   0x7   : > { %p99_p2 = scmp.eq.s32.totalorder %s415_s15, 1  ;;  %p104_p3 = scmp.ne.s32.totalorder %s569_s10, %s565_s9 }
   0x8   : > { %s741_s17 = smov (%p29_p0, %s27_s17), 0  ;;  %p105_p5 = scmp.eq.s32.totalorder %s416_s16, 1 }
   0x9   : > { %p648_p4 = por %p99_p2, %p98_p1  ;;  %s83_s20 = ssub.s32 %s581_s13, %s741_s17 }
   0xa   : > { %p420_p6 = scmp.ge.s32.totalorder %s585_s14, 1  ;;  %p86_p7 = scmp.eq.s32.totalorder %s83_s20, 0 }
   0xb   : > { %p655_p8 = por %p105_p5, %p104_p3  ;;  %p141_p9 = scmp.lt.s32.totalorder %s585_s14, 3 }
   0xc   : > { %s661_s22 = scalar_select %p86_p7, %s573_s11, %s88_s18  }
   0xd   : > { %p142_p10 = pnand %p420_p6, %p141_p9 }
   0xe   : > { %s421_s29 = sshll.u32 (!%p142_p10), %s577_s12, 1  ;;  %s165_s6 = sand.u32 (!%p142_p10), 1, %s569_s10  }
   0xf   : > { %145 = sbr.rel (%p142_p10) target bundleno = 241 (0xf1), region = 28  ;;  %p169_p11 = scmp.lt.s32.totalorder (!%p142_p10), %s421_s29, 3 }
  0x10   : > { %s442_s7 = smul.u32 (!%p142_p10), 48, %s165_s6  ;;  %s685_s23 = scalar_lea.sflag (!%p142_p10), [#allocation3], %s165_s6 }
  0x11   : > { %s443_s8 = smul.u32 (!%p142_p10), 768, %s577_s12  ;;  %s590_s25 = smov (!%p142_p10), [#allocation2]  }
  0x12   : > { %s167_s15 = scalar_lea.vmem (!%p142_p10), [#allocation2], %s442_s7  ;;  %s513_s26 = sshll.u32 (!%p142_p10), %s590_s25, 4  ;;  %s514_s26 = int_to_ptr.vmem [resolvable:$false] %s513_s26 }
  0x13   : > { %s327_s16 = sshll.u32 (!%p142_p10), %s167_s15, 4  ;;  %s683_s20 = scalar_lea.hbm (!%p142_p10), %s732_s2, %s443_s8  ;;  %s678_s16 = int_to_ptr.vmem [resolvable:$true] %s327_s16 }
  0x14   : > { %v504_v0 = vld [vmem:[%s731_s1 + $0x4] ss:$12 sps:$4 sm:$0xff]   ;;  %v587_v1 = vmov 0.0   ;;  %v506_v2 = vld [vmem:[%s731_s1] ss:$12 sps:$4 sm:$0xff]   ;;  %v588_v3 = vmov 0   ;;  %p516_p1 = scmp.lt.s32.totalorder %s678_s16, %s514_s26 }
  0x15   : > { %436 = vmatprep.subr.bf16.mxu1 %v587_v1  ;;  %246 = vmatprep.mubr.bf16.mxu0 %v588_v3  ;;  %v507_v4 = vld [vmem:[%s731_s1 + $0x8] ss:$12 sps:$4 sm:$0xff]   ;;  %vm589_vm0 = vmmov 0   ;;  %s743_s29 = smov (!%p169_p11, %s421_s29), 3  ;;  %vm210_vm1 = vcmask 130048   ;;  %s509_s24 = scalar_lea.vmem %s678_s16, 768 }
  0x16   : > { %228 = vmatprep.subr.bf16.mxu0 %v504_v0  ;;  %438 = vmatprep.mubr.msk.bf16.mxu1 %vm589_vm0, %v587_v1  ;;  %s422_s30 = sshll.u32 %s743_s29, 2  ;;  %p510_p12 = scmp.ne.s32.totalorder %s678_s16, %s509_s24 }
  0x17   : > { %229 = vmatpush1.bf16.msra.mxu0 %v506_v2  ;;  %437 = vmatpush3.bf16.msra.mxu1 %v507_v4  ;;  %s172_s5 = scalar_lea.vmem %s730_s0, %s422_s30  ;;  %s515_s27 = scalar_lea.vmem %s514_s26, 1536 }
  0x18   : > { %v508_v5 = vld [vmem:[%s172_s5] sm:$0xff]   ;;  %p511_p13 = pnand %p510_p12, %p648_p4  ;;  %p517_p2 = scmp.lt.s32.totalorder %s515_s27, %s509_s24 }
  0x1a   : > { %427 = vmatmul.mubr.msk.bf16.vlgmr.msra.gmra.mxu0 %vm210_vm1, %v508_v5  ;;  %439 = vmatmul.mubr.msk.bf16.vlgmr.msra.gmra.mxu1 %vm210_vm1, %v508_v5  ;;  %p512_p0 = pneg %p511_p13  ;;  %p518_p3 = por %p517_p2, %p516_p1 }
  0x1c   : > { %p519_p5 = pnand %p518_p3, %p512_p0 }
  0xda   : > { %v248_v6 = vpop.f32.mrf.mxu0  ;;  %v291_v7 = vpop.f32.mrf.mxu1 }
  0xdb   : > { %v298_v8 = vmax.f32 %v248_v6, 0.0  ;;  %v300_v9 = vmax.f32 %v291_v7, 0.0 }
  0xdc   : > { %v250_v10 = vpop.f32.mrf.mxu0  ;;  %v440_v11 = vpop.f32.mrf.mxu1 }
  0xdd   : > { %304 = vst [vmem:[%s167_s15] sm:$0xff] %v298_v8  ;;  %306 = vst [vmem:[%s167_s15 + $0x10] sm:$0xff] %v300_v9  ;;  %v299_v12 = vmax.f32 %v250_v10, 0.0 }
  0xde   : > { %v252_v13 = vpop.f32.mrf.mxu0  ;;  %v294_v14 = vpop.f32.mrf.mxu1 }
  0xdf   : > { %305 = vst [vmem:[%s167_s15 + $0x8] sm:$0xff] %v299_v12  ;;  %v301_v15 = vmax.f32 %v252_v13, 0.0  ;;  %v303_v16 = vmax.f32 %v294_v14, 0.0 }
  0xe0   : > { %v254_v17 = vpop.f32.mrf.mxu0  ;;  %v441_v18 = vpop.f32.mrf.mxu1 }
  0xe1   : > { %307 = vst [vmem:[%s167_s15 + $0x18] sm:$0xff] %v301_v15  ;;  %309 = vst [vmem:[%s167_s15 + $0x28] sm:$0xff] %v303_v16  ;;  %v302_v19 = vmax.f32 %v254_v17, 0.0 }
  0xe3   : > { %308 = vst [vmem:[%s167_s15 + $0x20] sm:$0xff] %v302_v19 }
  0xe4   : > { %522 = shalt.err (!%p519_p5)
}
  0xe5   : > { %s523_s28 = scalar_lea.hbm %s683_s20, 768  ;;  %s527_s3 = scalar_lea.hbm %s732_s2, 1536 }
  0xe6   : > { %p524_p6 = scmp.ne.s32.totalorder %s683_s20, %s523_s28  ;;  %p528_p10 = scmp.lt.s32.totalorder %s683_s20, %s732_s2 }
  0xe7   : > { %p529_p11 = scmp.lt.s32.totalorder %s527_s3, %s523_s28 }
  0xe8   : > { %p525_p7 = pnand %p524_p6, %p648_p4 }
  0xe9   : > { %p530_p12 = por %p529_p11, %p528_p10 }
  0xea   : > { %p526_p9 = pneg %p525_p7 }
  0xec   : > { %p531_p13 = pnand %p530_p12, %p526_p9 }
  0xee   : > { %534 = shalt.err (!%p531_p13)
}
  0xef   : > { %s591_s6 = smov 384   ;;  %s592_s7 = smov 24  }
  0xf0   : > { %444 = dma.vmem_to_hbm [thread:$0]  (%p648_p4), %s678_s16, 768, %s683_s20, %s685_s23, %s591_s6, %s591_s6, %s592_s7  }
  0xf1 PF: > { %p450_p0 = scmp.ge.s32.totalorder %s585_s14, 2  ;;  %s342_s8 = sand.u32 1, %s565_s9  }
  0xf2   : > { %s343_s15 = scalar_lea.sflag [#allocation3], %s342_s8 }
  0xf3   : > { %p447_p1 = pnand %p450_p0, %p655_p8 }
  0xf5   : > { %p448_p2 = pneg %p447_p1 }
  0xf7   : > { %560 = dma.done.wait (%p448_p2), %s343_s15, 768  }
  0xf8   : > { %562 = vsyncadd (%p448_p2), %s343_s15, 4294966528  ;;  %s15_s14 = sadd.s32 1, %s585_s14   ;;  %s735_s9 = smov %s569_s10 }
  0xf9   : > { %p12_p3 = scmp.ge.s32.totalorder %s15_s14, 4   ;;  %s736_s10 = smov %s573_s11 }
  0xfa   : > { %s737_s11 = smov %s661_s22  ;;  %s738_s12 = smov %s581_s13 }
  0xfb   : > { %s739_s13 = smov %s741_s17  ;;  %14 = sbr.rel (!%p12_p3) target bundleno = 4 (0x4), region = 66 }
 0x100   :  { %348 = vsyncpa [#allocation3], 1 }
 0x101   :  { %350 = vsyncpa [#allocation3 + $0x1], 1 }

</bundles_post_ra>
